<compile_context>
chip_gen: v7x
topology: tpu7x:2x2x1
jax: 0.10.0
libtpu: 0.0.40
codegen_flags: <defaults>
</compile_context>

<pallas_src>
import functools

import jax
import jax.numpy as jnp
import numpy as np
from jax.experimental import pallas as pl
from jax.experimental.pallas import tpu as pltpu

WEIGHT_DTYPE = jnp.bfloat16   # MXU operand dtype for the wide (256x256) layers


# ----------------------------------------------------------------------------
# Fused kernel: one grid step = one N-BEATS block applied to one batch tile.
#   carry[:, :L] = backcast residual, carry[:, L:] = forecast accumulator.
# ----------------------------------------------------------------------------
def nbeats_fused_kernel(x_ref, w1_ref, b1_ref, w2_ref, b2_ref, w3_ref, b3_ref,
                        w4_ref, b4_ref, wp_ref, bp_ref, carry_ref):
    @pl.when(pl.program_id(1) == 0)
    def _():
        # carry starts as [x | zeros(F)] (x already padded with forecast lanes).
        carry_ref[...] = x_ref[...]

    carry = carry_ref[...]                      # f32 (tile_b, L+F)

    # fc1 fully in f32: its LHS is the backcast residual, which we never
    # re-quantize across blocks. (K = L+F is tiny, f32 MXU passes are free.)
    h = jnp.dot(carry, w1_ref[0], preferred_element_type=jnp.float32) + b1_ref[0]
    h = jnp.maximum(h, 0.0).astype(jnp.bfloat16)

    def hidden(a, w_ref, b_ref):
        # bf16 MXU operands, f32 accumulation; cast back to bf16 right after
        # the ReLU to halve the (tile_b, 256) intermediate's VMEM traffic.
        y = jnp.dot(a, w_ref[0], preferred_element_type=jnp.float32) + b_ref[0]
        return jnp.maximum(y, 0.0).astype(jnp.bfloat16)

    h = hidden(h, w2_ref, b2_ref)
    h = hidden(h, w3_ref, b3_ref)
    h = hidden(h, w4_ref, b4_ref)

    # Folded projection: P = W_theta @ [-basis_b | basis_f], bias sign-folded,
    # so the residual update + forecast accumulation is one add.
    delta = jnp.dot(h, wp_ref[0], preferred_element_type=jnp.float32) + bp_ref[0]
    carry_ref[...] = carry + delta


# ----------------------------------------------------------------------------
# Basis construction (matches the torch helpers).
# ----------------------------------------------------------------------------
def linear_space(backcast_length, forecast_length, is_forecast=True):
    horizon = forecast_length if is_forecast else backcast_length
    return np.arange(0, horizon) / horizon


def trend_basis(p, t):
    assert p <= 4, "thetas_dim is too big."
    return np.stack([t ** i for i in range(p)]).astype(np.float32)        # (p, horizon)


def seasonality_basis(p, t):
    p1, p2 = (p // 2, p // 2) if p % 2 == 0 else (p // 2, p // 2 + 1)
    s1 = np.stack([np.cos(2 * np.pi * i * t) for i in range(p1)])
    s2 = np.stack([np.sin(2 * np.pi * i * t) for i in range(p2)])
    return np.concatenate([s1, s2]).astype(np.float32)                    # (p, horizon)


# ----------------------------------------------------------------------------
# Parameter init (mimics nn.Linear: U(-1/sqrt(fan_in), 1/sqrt(fan_in))).
# Weights stored transposed (in, out) so everything is x @ W.
# ----------------------------------------------------------------------------
def _uniform(key, shape, fan_in):
    bound = 1.0 / np.sqrt(fan_in)
    return jax.random.uniform(key, shape, jnp.float32, -bound, bound)


def init_block_params(key, block_type, units, thetas_dim,
                      backcast_length, forecast_length):
    k = jax.random.split(key, 14)

    def linear(kw, kb, fan_in, fan_out, w_dtype):
        w = _uniform(kw, (fan_in, fan_out), fan_in).astype(w_dtype)
        b = _uniform(kb, (1, fan_out), fan_in)                 # bias stays f32
        return w, b

    # fc1 stays f32 (see kernel comment); the 256x256 layers are bf16.
    w1, b1 = linear(k[0], k[1], backcast_length, units, jnp.float32)
    w2, b2 = linear(k[2], k[3], units, units, WEIGHT_DTYPE)
    w3, b3 = linear(k[4], k[5], units, units, WEIGHT_DTYPE)
    w4, b4 = linear(k[6], k[7], units, units, WEIGHT_DTYPE)

    t_back = linear_space(backcast_length, forecast_length, is_forecast=False)
    t_fore = linear_space(backcast_length, forecast_length, is_forecast=True)

    if block_type == "generic":
        w_theta_b = _uniform(k[8], (units, thetas_dim), units).astype(WEIGHT_DTYPE)
        w_theta_f = _uniform(k[9], (units, thetas_dim), units).astype(WEIGHT_DTYPE)
        basis_b, bias_b = linear(k[10], k[11], thetas_dim, backcast_length, WEIGHT_DTYPE)
        basis_f, bias_f = linear(k[12], k[13], thetas_dim, forecast_length, WEIGHT_DTYPE)
    else:
        # trend / seasonality: share_thetas=True, theta fc has no bias,
        # basis expansion is a fixed matrix, no basis bias.
        w_theta = _uniform(k[8], (units, thetas_dim), units).astype(WEIGHT_DTYPE)
        w_theta_b = w_theta_f = w_theta
        make_basis = trend_basis if block_type == "trend" else seasonality_basis
        basis_b = jnp.asarray(make_basis(thetas_dim, t_back), WEIGHT_DTYPE)
        basis_f = jnp.asarray(make_basis(thetas_dim, t_fore), WEIGHT_DTYPE)
        bias_b = jnp.zeros((1, backcast_length), jnp.float32)
        bias_f = jnp.zeros((1, forecast_length), jnp.float32)

    return dict(w1=w1, b1=b1, w2=w2, b2=b2, w3=w3, b3=b3, w4=w4, b4=b4,
                w_theta_b=w_theta_b, w_theta_f=w_theta_f,
                basis_b=basis_b, bias_b=bias_b,
                basis_f=basis_f, bias_f=bias_f)


def init_nbeats_params(key,
                       stack_types=("trend", "seasonality"),
                       nb_blocks_per_stack=3,
                       forecast_length=5, backcast_length=10,
                       thetas_dim=(4, 8),
                       hidden_layer_units=256):
    keys = jax.random.split(key, len(stack_types) * nb_blocks_per_stack)
    blocks, i = [], 0
    for sid, st in enumerate(stack_types):
        for _ in range(nb_blocks_per_stack):
            blocks.append(init_block_params(keys[i], st, hidden_layer_units,
                                            thetas_dim[sid],
                                            backcast_length, forecast_length))
            i += 1
    return blocks


# ----------------------------------------------------------------------------
# Offline prep: fold theta@basis (+ signs + biases), pad fc1, stack per block.
# The fold is exact (associativity); it is computed in f32 and cast once.
# ----------------------------------------------------------------------------
_FUSED_KEYS = ("w1", "b1", "w2", "b2", "w3", "b3", "w4", "b4", "wp", "bp")


def prepare_fused_params(blocks, backcast_length, forecast_length):
    L, F = backcast_length, forecast_length
    f32 = lambda a: jnp.asarray(a, jnp.float32)
    acc = {k: [] for k in _FUSED_KEYS}
    for p in blocks:
        units = p["w1"].shape[1]
        # fc1 weight zero-padded with F rows -> fc1 consumes the whole carry
        # (forecast lanes multiply exact zeros), no lane-slicing in-kernel.
        w1_pad = jnp.zeros((L + F, units), jnp.float32).at[:L, :].set(f32(p["w1"]))
        acc["w1"].append(w1_pad);        acc["b1"].append(f32(p["b1"]))
        acc["w2"].append(p["w2"]);       acc["b2"].append(f32(p["b2"]))
        acc["w3"].append(p["w3"]);       acc["b3"].append(f32(p["b3"]))
        acc["w4"].append(p["w4"]);       acc["b4"].append(f32(p["b4"]))
        pb = f32(p["w_theta_b"]) @ f32(p["basis_b"])        # (U, L)
        pf = f32(p["w_theta_f"]) @ f32(p["basis_f"])        # (U, F)
        acc["wp"].append(jnp.concatenate([-pb, pf], axis=1).astype(WEIGHT_DTYPE))
        acc["bp"].append(jnp.concatenate([-f32(p["bias_b"]), f32(p["bias_f"])], axis=1))
    return {k: jnp.stack(v, axis=0) for k, v in acc.items()}


# ----------------------------------------------------------------------------
# Wrapper.
# ----------------------------------------------------------------------------
def squeeze_last_dim(x):
    if x.ndim == 3 and x.shape[-1] == 1:
        return x[..., 0]
    return x


def _round_up(n, m):
    return ((n + m - 1) // m) * m


def _tile_cap():
    try:
        kind = jax.devices()[0].device_kind.lower()
    except Exception:
        return 256
    if "v5" in kind:
        return 128    # v5e: 4x128^2 MXU; bigger M tiles only add vreg/VMEM pressure
    if "v6" in kind:
        return 512    # amortize ~0.35us per-grid-step overhead on large batches
    return 256


def _pick_batch_tile(batch):
    cap = _tile_cap()
    # >=2 steps on the parallel grid axis so both v7x TensorCores get work.
    tile = _round_up(max((batch + 1) // 2, 1), 8)
    return int(max(8, min(cap, tile)))


@functools.partial(jax.jit, static_argnames=("tile_b", "forecast_length"))
def _nbeats_fused_forward(x2d, fused, *, tile_b, forecast_length):
    B, L = x2d.shape
    F = forecast_length
    LF = L + F
    n_blocks, _, U = fused["w2"].shape
    Bp = _round_up(B, tile_b)

    # Combined carry: [:, :L] backcast residual (init = x), [:, L:] forecast (init = 0).
    carry0 = jnp.zeros((Bp, LF), jnp.float32).at[:B, :L].set(x2d)

    weights = [fused[k] for k in _FUSED_KEYS]

    flops = 2 * Bp * n_blocks * (LF * U + 3 * U * U + U * LF)
    weight_bytes = sum(int(a.size) * a.dtype.itemsize for a in weights)
    bytes_accessed = weight_bytes * (Bp // tile_b) + 3 * Bp * LF * 4

    carry = pl.pallas_call(
        nbeats_fused_kernel,
        out_shape=jax.ShapeDtypeStruct((Bp, LF), jnp.float32),
        grid=(Bp // tile_b, n_blocks),
        in_specs=[pl.BlockSpec((tile_b, LF), lambda i, k: (i, 0))]
                 + [pl.BlockSpec((1,) + a.shape[1:], lambda i, k: (k, 0, 0))
                    for a in weights],
        out_specs=pl.BlockSpec((tile_b, LF), lambda i, k: (i, 0)),
        compiler_params=pltpu.CompilerParams(
            dimension_semantics=("parallel", "arbitrary")),
        cost_estimate=pl.CostEstimate(flops=int(flops), transcendentals=0,
                                      bytes_accessed=int(bytes_accessed)),
    )(carry0, *weights)

    return carry[:B, :L], carry[:B, L:]


def nbeats_forward(x, fused, *, forecast_length, tile_b=None):
    """NBeatsNet.forward: returns (backcast_residual, forecast)."""
    x2d = squeeze_last_dim(x).astype(jnp.float32)
    if tile_b is None:
        tile_b = _pick_batch_tile(x2d.shape[0])
    return _nbeats_fused_forward(x2d, fused, tile_b=tile_b,
                                 forecast_length=forecast_length)


# ----------------------------------------------------------------------------
# Pure-JAX f32 reference (unfolded, matches the torch forward structure).
# ----------------------------------------------------------------------------
def nbeats_forward_ref(x, blocks, forecast_length):
    x = squeeze_last_dim(x).astype(jnp.float32)
    backcast = x
    forecast = jnp.zeros((x.shape[0], forecast_length), jnp.float32)
    f32 = lambda a: a.astype(jnp.float32)
    for p in blocks:
        h = backcast
        h = jnp.maximum(h @ f32(p["w1"]) + p["b1"], 0.0)
        h = jnp.maximum(h @ f32(p["w2"]) + p["b2"], 0.0)
        h = jnp.maximum(h @ f32(p["w3"]) + p["b3"], 0.0)
        h = jnp.maximum(h @ f32(p["w4"]) + p["b4"], 0.0)
        theta_b = h @ f32(p["w_theta_b"])
        theta_f = h @ f32(p["w_theta_f"])
        b = theta_b @ f32(p["basis_b"]) + p["bias_b"]
        f = theta_f @ f32(p["basis_f"]) + p["bias_f"]
        backcast = backcast - b
        forecast = forecast + f
    return backcast, forecast


if __name__ == "__main__":
    key = jax.random.PRNGKey(0)
    k_params, k_x = jax.random.split(key)

    backcast_length = 10
    forecast_length = 5
    hidden_layer_units = 256          # default N-BEATS width; lane-dense
    thetas_dim = (4, 8)
    batch = 16

    blocks = init_nbeats_params(
        k_params,
        stack_types=("trend", "seasonality"),
        nb_blocks_per_stack=3,
        forecast_length=forecast_length,
        backcast_length=backcast_length,
        thetas_dim=thetas_dim,
        hidden_layer_units=hidden_layer_units,
    )
    fused = prepare_fused_params(blocks, backcast_length, forecast_length)

    # Trailing singleton dim exercises squeeze_last_dim, as in the torch model.
    x = jax.random.normal(k_x, (batch, backcast_length, 1), jnp.float32)

    backcast, forecast = nbeats_forward(x, fused, forecast_length=forecast_length)
    backcast, forecast = jax.block_until_ready((backcast, forecast))

    ref_b, ref_f = nbeats_forward_ref(x, blocks, forecast_length)

    assert backcast.shape == (batch, backcast_length), backcast.shape
    assert forecast.shape == (batch, forecast_length), forecast.shape
    # bf16 hidden layers / folded projection -> relaxed tolerance vs f32 ref.
    assert jnp.allclose(backcast, ref_b, rtol=5e-2, atol=5e-2), "backcast mismatch"
    assert jnp.allclose(forecast, ref_f, rtol=5e-2, atol=5e-2), "forecast mismatch"

    print("KERNEL_OK")
</pallas_src>

<mosaic_0001>
module attributes {stable_mosaic.version = 11 : i64} {
  func.func @nbeats_fused_kernel(%arg0: i32, %arg1: i32, %arg2: memref<8x15xf32, #tpu.memory_space<vmem>>, %arg3: memref<1x15x256xf32, #tpu.memory_space<vmem>>, %arg4: memref<1x1x256xf32, #tpu.memory_space<vmem>>, %arg5: memref<1x256x256xbf16, #tpu.memory_space<vmem>>, %arg6: memref<1x1x256xf32, #tpu.memory_space<vmem>>, %arg7: memref<1x256x256xbf16, #tpu.memory_space<vmem>>, %arg8: memref<1x1x256xf32, #tpu.memory_space<vmem>>, %arg9: memref<1x256x256xbf16, #tpu.memory_space<vmem>>, %arg10: memref<1x1x256xf32, #tpu.memory_space<vmem>>, %arg11: memref<1x256x15xbf16, #tpu.memory_space<vmem>>, %arg12: memref<1x1x15xf32, #tpu.memory_space<vmem>>, %arg13: memref<8x15xf32, #tpu.memory_space<vmem>>) attributes {dimension_semantics = [#tpu.dimension_semantics<parallel>, #tpu.dimension_semantics<arbitrary>], iteration_bounds = array<i64: 2, 6>, scalar_prefetch = 0 : i64, scratch_operands = 0 : i64, tpu.core_type = #tpu.core_type<tc>, window_params = [{transform_indices = @transform_0, window_bounds = array<i64: 8, 15>}, {transform_indices = @transform_1, window_bounds = array<i64: 1, 15, 256>}, {transform_indices = @transform_2, window_bounds = array<i64: 1, 1, 256>}, {transform_indices = @transform_3, window_bounds = array<i64: 1, 256, 256>}, {transform_indices = @transform_4, window_bounds = array<i64: 1, 1, 256>}, {transform_indices = @transform_5, window_bounds = array<i64: 1, 256, 256>}, {transform_indices = @transform_6, window_bounds = array<i64: 1, 1, 256>}, {transform_indices = @transform_7, window_bounds = array<i64: 1, 256, 256>}, {transform_indices = @transform_8, window_bounds = array<i64: 1, 1, 256>}, {transform_indices = @transform_9, window_bounds = array<i64: 1, 256, 15>}, {transform_indices = @transform_10, window_bounds = array<i64: 1, 1, 15>}, {transform_indices = @transform_11, window_bounds = array<i64: 8, 15>}]} {
    %c0_i32 = arith.constant 0 : i32
    %0 = arith.cmpi eq, %arg1, %c0_i32 : i32
    %1 = arith.extui %0 : i1 to i32
    %c0_i32_0 = arith.constant 0 : i32
    %2 = arith.cmpi ne, %1, %c0_i32_0 : i32
    scf.if %2 {
      %c0_42 = arith.constant 0 : index
      %c0_43 = arith.constant 0 : index
      %53 = vector.load %arg2[%c0_42, %c0_43] : memref<8x15xf32, #tpu.memory_space<vmem>>, vector<8x15xf32>
      %c0_44 = arith.constant 0 : index
      %c0_45 = arith.constant 0 : index
      %54 = vector.load %arg13[%c0_44, %c0_45] : memref<8x15xf32, #tpu.memory_space<vmem>>, vector<8x15xf32>
      tpu.vector_store %arg13[%c0_44, %c0_45], %53 {strides = array<i32>} : memref<8x15xf32, #tpu.memory_space<vmem>>, vector<8x15xf32>,
    } else {
    }
    %c0 = arith.constant 0 : index
    %c0_1 = arith.constant 0 : index
    %3 = vector.load %arg13[%c0, %c0_1] : memref<8x15xf32, #tpu.memory_space<vmem>>, vector<8x15xf32>
    %c0_2 = arith.constant 0 : index
    %c0_3 = arith.constant 0 : index
    %c0_4 = arith.constant 0 : index
    %4 = vector.load %arg3[%c0_2, %c0_3, %c0_4] : memref<1x15x256xf32, #tpu.memory_space<vmem>>, vector<1x15x256xf32>
    %5 = vector.shape_cast %4 : vector<1x15x256xf32> to vector<15x256xf32>
    %cst = arith.constant dense<0.000000e+00> : vector<8x256xf32>
    %6 = tpu.matmul %3, %5, %cst {dimension_numbers = #tpu.dot_dimension_numbers<[1], [0], [0], [1], [0, 0, 1, 1], [], []>} : vector<8x15xf32>, vector<15x256xf32>, vector<8x256xf32> -> vector<8x256xf32>
    %c0_5 = arith.constant 0 : index
    %c0_6 = arith.constant 0 : index
    %c0_7 = arith.constant 0 : index
    %7 = vector.load %arg4[%c0_5, %c0_6, %c0_7] : memref<1x1x256xf32, #tpu.memory_space<vmem>>, vector<1x1x256xf32>
    %8 = vector.shape_cast %7 : vector<1x1x256xf32> to vector<1x256xf32>
    %9 = vector.broadcast %8 : vector<1x256xf32> to vector<8x256xf32>
    %10 = arith.addf %6, %9 : vector<8x256xf32>
    %cst_8 = arith.constant 0.000000e+00 : f32
    %11 = vector.broadcast %cst_8 : f32 to vector<8x256xf32>
    %12 = arith.maximumf %10, %11 : vector<8x256xf32>
    %13 = arith.truncf %12 : vector<8x256xf32> to vector<8x256xbf16>
    %c0_9 = arith.constant 0 : index
    %c0_10 = arith.constant 0 : index
    %c0_11 = arith.constant 0 : index
    %14 = vector.load %arg5[%c0_9, %c0_10, %c0_11] : memref<1x256x256xbf16, #tpu.memory_space<vmem>>, vector<1x256x256xbf16>
    %15 = vector.shape_cast %14 : vector<1x256x256xbf16> to vector<256x256xbf16>
    %cst_12 = arith.constant dense<0.000000e+00> : vector<8x256xf32>
    %16 = tpu.matmul %13, %15, %cst_12 {dimension_numbers = #tpu.dot_dimension_numbers<[1], [0], [0], [1], [0, 0, 1, 1], [], []>} : vector<8x256xbf16>, vector<256x256xbf16>, vector<8x256xf32> -> vector<8x256xf32>
    %c0_13 = arith.constant 0 : index
    %c0_14 = arith.constant 0 : index
    %c0_15 = arith.constant 0 : index
    %17 = vector.load %arg6[%c0_13, %c0_14, %c0_15] : memref<1x1x256xf32, #tpu.memory_space<vmem>>, vector<1x1x256xf32>
    %18 = vector.shape_cast %17 : vector<1x1x256xf32> to vector<1x256xf32>
    %19 = vector.broadcast %18 : vector<1x256xf32> to vector<8x256xf32>
    %20 = arith.addf %16, %19 : vector<8x256xf32>
    %cst_16 = arith.constant 0.000000e+00 : f32
    %21 = vector.broadcast %cst_16 : f32 to vector<8x256xf32>
    %22 = arith.maximumf %20, %21 : vector<8x256xf32>
    %23 = arith.truncf %22 : vector<8x256xf32> to vector<8x256xbf16>
    %c0_17 = arith.constant 0 : index
    %c0_18 = arith.constant 0 : index
    %c0_19 = arith.constant 0 : index
    %24 = vector.load %arg7[%c0_17, %c0_18, %c0_19] : memref<1x256x256xbf16, #tpu.memory_space<vmem>>, vector<1x256x256xbf16>
    %25 = vector.shape_cast %24 : vector<1x256x256xbf16> to vector<256x256xbf16>
    %cst_20 = arith.constant dense<0.000000e+00> : vector<8x256xf32>
    %26 = tpu.matmul %23, %25, %cst_20 {dimension_numbers = #tpu.dot_dimension_numbers<[1], [0], [0], [1], [0, 0, 1, 1], [], []>} : vector<8x256xbf16>, vector<256x256xbf16>, vector<8x256xf32> -> vector<8x256xf32>
    %c0_21 = arith.constant 0 : index
    %c0_22 = arith.constant 0 : index
    %c0_23 = arith.constant 0 : index
    %27 = vector.load %arg8[%c0_21, %c0_22, %c0_23] : memref<1x1x256xf32, #tpu.memory_space<vmem>>, vector<1x1x256xf32>
    %28 = vector.shape_cast %27 : vector<1x1x256xf32> to vector<1x256xf32>
    %29 = vector.broadcast %28 : vector<1x256xf32> to vector<8x256xf32>
    %30 = arith.addf %26, %29 : vector<8x256xf32>
    %cst_24 = arith.constant 0.000000e+00 : f32
    %31 = vector.broadcast %cst_24 : f32 to vector<8x256xf32>
    %32 = arith.maximumf %30, %31 : vector<8x256xf32>
    %33 = arith.truncf %32 : vector<8x256xf32> to vector<8x256xbf16>
    %c0_25 = arith.constant 0 : index
    %c0_26 = arith.constant 0 : index
    %c0_27 = arith.constant 0 : index
    %34 = vector.load %arg9[%c0_25, %c0_26, %c0_27] : memref<1x256x256xbf16, #tpu.memory_space<vmem>>, vector<1x256x256xbf16>
    %35 = vector.shape_cast %34 : vector<1x256x256xbf16> to vector<256x256xbf16>
    %cst_28 = arith.constant dense<0.000000e+00> : vector<8x256xf32>
    %36 = tpu.matmul %33, %35, %cst_28 {dimension_numbers = #tpu.dot_dimension_numbers<[1], [0], [0], [1], [0, 0, 1, 1], [], []>} : vector<8x256xbf16>, vector<256x256xbf16>, vector<8x256xf32> -> vector<8x256xf32>
    %c0_29 = arith.constant 0 : index
    %c0_30 = arith.constant 0 : index
    %c0_31 = arith.constant 0 : index
    %37 = vector.load %arg10[%c0_29, %c0_30, %c0_31] : memref<1x1x256xf32, #tpu.memory_space<vmem>>, vector<1x1x256xf32>
    %38 = vector.shape_cast %37 : vector<1x1x256xf32> to vector<1x256xf32>
    %39 = vector.broadcast %38 : vector<1x256xf32> to vector<8x256xf32>
    %40 = arith.addf %36, %39 : vector<8x256xf32>
    %cst_32 = arith.constant 0.000000e+00 : f32
    %41 = vector.broadcast %cst_32 : f32 to vector<8x256xf32>
    %42 = arith.maximumf %40, %41 : vector<8x256xf32>
    %43 = arith.truncf %42 : vector<8x256xf32> to vector<8x256xbf16>
    %c0_33 = arith.constant 0 : index
    %c0_34 = arith.constant 0 : index
    %c0_35 = arith.constant 0 : index
    %44 = vector.load %arg11[%c0_33, %c0_34, %c0_35] : memref<1x256x15xbf16, #tpu.memory_space<vmem>>, vector<1x256x15xbf16>
    %45 = vector.shape_cast %44 : vector<1x256x15xbf16> to vector<256x15xbf16>
    %cst_36 = arith.constant dense<0.000000e+00> : vector<8x15xf32>
    %46 = tpu.matmul %43, %45, %cst_36 {dimension_numbers = #tpu.dot_dimension_numbers<[1], [0], [0], [1], [0, 0, 1, 1], [], []>} : vector<8x256xbf16>, vector<256x15xbf16>, vector<8x15xf32> -> vector<8x15xf32>
    %c0_37 = arith.constant 0 : index
    %c0_38 = arith.constant 0 : index
    %c0_39 = arith.constant 0 : index
    %47 = vector.load %arg12[%c0_37, %c0_38, %c0_39] : memref<1x1x15xf32, #tpu.memory_space<vmem>>, vector<1x1x15xf32>
    %48 = vector.shape_cast %47 : vector<1x1x15xf32> to vector<1x15xf32>
    %49 = vector.broadcast %48 : vector<1x15xf32> to vector<8x15xf32>
    %50 = arith.addf %46, %49 : vector<8x15xf32>
    %51 = arith.addf %3, %50 : vector<8x15xf32>
    %c0_40 = arith.constant 0 : index
    %c0_41 = arith.constant 0 : index
    %52 = vector.load %arg13[%c0_40, %c0_41] : memref<8x15xf32, #tpu.memory_space<vmem>>, vector<8x15xf32>
    tpu.vector_store %arg13[%c0_40, %c0_41], %51 {strides = array<i32>} : memref<8x15xf32, #tpu.memory_space<vmem>>, vector<8x15xf32>,
    return
  }
  func.func @transform_0(%arg0: i32, %arg1: i32) -> (i32, i32) {
    %c0_i32 = arith.constant 0 : i32
    %c0_i32_0 = arith.constant 0 : i32
    return %arg0, %c0_i32 : i32, i32
  }
  func.func @transform_1(%arg0: i32, %arg1: i32) -> (i32, i32, i32) {
    %c0_i32 = arith.constant 0 : i32
    %c0_i32_0 = arith.constant 0 : i32
    %c0_i32_1 = arith.constant 0 : i32
    return %arg1, %c0_i32, %c0_i32_0 : i32, i32, i32
  }
  func.func @transform_2(%arg0: i32, %arg1: i32) -> (i32, i32, i32) {
    %c0_i32 = arith.constant 0 : i32
    %c0_i32_0 = arith.constant 0 : i32
    %c0_i32_1 = arith.constant 0 : i32
    return %arg1, %c0_i32, %c0_i32_0 : i32, i32, i32
  }
  func.func @transform_3(%arg0: i32, %arg1: i32) -> (i32, i32, i32) {
    %c0_i32 = arith.constant 0 : i32
    %c0_i32_0 = arith.constant 0 : i32
    %c0_i32_1 = arith.constant 0 : i32
    return %arg1, %c0_i32, %c0_i32_0 : i32, i32, i32
  }
  func.func @transform_4(%arg0: i32, %arg1: i32) -> (i32, i32, i32) {
    %c0_i32 = arith.constant 0 : i32
    %c0_i32_0 = arith.constant 0 : i32
    %c0_i32_1 = arith.constant 0 : i32
    return %arg1, %c0_i32, %c0_i32_0 : i32, i32, i32
  }
  func.func @transform_5(%arg0: i32, %arg1: i32) -> (i32, i32, i32) {
    %c0_i32 = arith.constant 0 : i32
    %c0_i32_0 = arith.constant 0 : i32
    %c0_i32_1 = arith.constant 0 : i32
    return %arg1, %c0_i32, %c0_i32_0 : i32, i32, i32
  }
  func.func @transform_6(%arg0: i32, %arg1: i32) -> (i32, i32, i32) {
    %c0_i32 = arith.constant 0 : i32
    %c0_i32_0 = arith.constant 0 : i32
    %c0_i32_1 = arith.constant 0 : i32
    return %arg1, %c0_i32, %c0_i32_0 : i32, i32, i32
  }
  func.func @transform_7(%arg0: i32, %arg1: i32) -> (i32, i32, i32) {
    %c0_i32 = arith.constant 0 : i32
    %c0_i32_0 = arith.constant 0 : i32
    %c0_i32_1 = arith.constant 0 : i32
    return %arg1, %c0_i32, %c0_i32_0 : i32, i32, i32
  }
  func.func @transform_8(%arg0: i32, %arg1: i32) -> (i32, i32, i32) {
    %c0_i32 = arith.constant 0 : i32
    %c0_i32_0 = arith.constant 0 : i32
    %c0_i32_1 = arith.constant 0 : i32
    return %arg1, %c0_i32, %c0_i32_0 : i32, i32, i32
  }
  func.func @transform_9(%arg0: i32, %arg1: i32) -> (i32, i32, i32) {
    %c0_i32 = arith.constant 0 : i32
    %c0_i32_0 = arith.constant 0 : i32
    %c0_i32_1 = arith.constant 0 : i32
    return %arg1, %c0_i32, %c0_i32_0 : i32, i32, i32
  }
  func.func @transform_10(%arg0: i32, %arg1: i32) -> (i32, i32, i32) {
    %c0_i32 = arith.constant 0 : i32
    %c0_i32_0 = arith.constant 0 : i32
    %c0_i32_1 = arith.constant 0 : i32
    return %arg1, %c0_i32, %c0_i32_0 : i32, i32, i32
  }
  func.func @transform_11(%arg0: i32, %arg1: i32) -> (i32, i32) {
    %c0_i32 = arith.constant 0 : i32
    %c0_i32_0 = arith.constant 0 : i32
    return %arg0, %c0_i32 : i32, i32
  }
}

</mosaic_0001>

<bundles_post_ra>
// kernel: _nbeats_fused_forward.1
= control target key start
LH: loop header
LB: loop body
LE: loop exit
PB: predicated region body
PF: predicated region fallthrough
CT: control target
= control target key end

     0   :  { %s2980_s0 = inlined_call_operand.vmem [shape: f32[16,15], index: 0, kind: input, shape index: {}]   ;;  %s2981_s1 = inlined_call_operand.vmem [shape: f32[6,15,256], index: 1, kind: input, shape index: {}]   ;;  %s2982_s2 = inlined_call_operand.vmem [shape: f32[6,1,256], index: 2, kind: input, shape index: {}]   ;;  %s2983_s3 = inlined_call_operand.hbm [shape: bf16[6,256,256], index: 3, kind: input, shape index: {}]   ;;  %s2984_s4 = inlined_call_operand.vmem [shape: f32[6,1,256], index: 4, kind: input, shape index: {}]   ;;  %s2985_s5 = inlined_call_operand.hbm [shape: bf16[6,256,256], index: 5, kind: input, shape index: {}]   ;;  %s2986_s6 = inlined_call_operand.vmem [shape: f32[6,1,256], index: 6, kind: input, shape index: {}]   ;;  %s2987_s7 = inlined_call_operand.hbm [shape: bf16[6,256,256], index: 7, kind: input, shape index: {}]   ;;  %s2988_s8 = inlined_call_operand.vmem [shape: f32[6,1,256], index: 8, kind: input, shape index: {}]   ;;  %s2989_s9 = inlined_call_operand.vmem [shape: bf16[6,256,15], index: 9, kind: input, shape index: {}]   ;;  %s2990_s10 = inlined_call_operand.vmem [shape: f32[6,1,15], index: 10, kind: input, shape index: {}]   ;;  %s2991_s11 = inlined_call_operand.vmem [shape: f32[16,15], index: 11, kind: output, shape index: {}]  }
   0x1   :  { %3005 = sst [smem:[#allocation17_spill]] %s2980_s0 }
   0x2   :  { %3006 = sst [smem:[#allocation18_spill]] %s2981_s1 }
   0x3   :  { %3007 = sst [smem:[#allocation19_spill]] %s2983_s3 }
   0x4   :  { %3008 = sst [smem:[#allocation20_spill]] %s2984_s4 }
   0x5   :  { %3009 = sst [smem:[#allocation21_spill]] %s2985_s5 }
   0x6   :  { %3010 = sst [smem:[#allocation22_spill]] %s2987_s7 }
   0x7   :  { %3011 = sst [smem:[#allocation23_spill]] %s2989_s9 }
   0x8   :  { %3012 = sst [smem:[#allocation24_spill]] %s2990_s10 }
   0x9   :  { %3013 = sst [smem:[#allocation25_spill]] %s2991_s11 }
   0xa   :  { %16 = vsyncpa [#allocation3], 0 }
   0xb   :  { %18 = vsyncpa [#allocation3 + $0x1], 0 }
   0xc   :  { %19 = vsyncpa [#allocation5], 0 }
   0xd   :  { %21 = vsyncpa [#allocation5 + $0x1], 0  ;;  %s2533_s17 = smov 0   ;;  %s2535_s18 = smov 0  }
   0xe   :  { %s2537_s19 = smov 0   ;;  %s2539_s20 = smov 0  }
   0xf   :  { %s2541_s21 = smov 0   ;;  %s2543_s22 = smov 0  }
  0x10   :  { %s2545_s23 = smov 0   ;;  %s2547_s24 = smov 0  }
  0x11 LB: > { %3014 = sst [smem:[#allocation9_spill]] %s2440_s18  ;;  %s2992_s25 = sadd.s32 4294967295, %s2464_s24   ;;  %s2464_s24 = sphi %s2547_s24, %s27_s24   ;;  %s2460_s23 = sphi %s2545_s23, %s3053_s23   ;;  %s2456_s22 = sphi %s2543_s22, %s3052_s22   ;;  %s2452_s21 = sphi %s2541_s21, %s3051_s21   ;;  %s2448_s20 = sphi %s2539_s20, %s3050_s20   ;;  %s2444_s19 = sphi %s2537_s19, %s3049_s19   ;;  %s2440_s18 = sphi %s2535_s18, %s3048_s18   ;;  %s2436_s17 = sphi %s2533_s17, %s3047_s17  }
  0x12   : > { %3015 = sst [smem:[#allocation10_spill]] %s2444_s19  ;;  %s36_s26 = sadd.s32 1, %s2456_s22 }
  0x13   : > { %3016 = sst [smem:[#allocation11_spill]] %s2456_s22  ;;  %p37_p0 = scmp.ge.s32.totalorder %s36_s26, 6 }
  0x14   : > { %3017 = sst [smem:[#allocation12_spill]] %s2460_s23  ;;  %s39_s27 = sadd.s32 1, %s2460_s23 }
  0x15   : > { %3018 = sst [smem:[#allocation13_spill]] %s2464_s24  ;;  %s124_s28 = sadd.s32 1, %s2444_s19 }
  0x16   : > { %p131_p1 = scmp.ne.s32.totalorder %s2444_s19, %s2440_s18  ;;  %s3055_s26 = smov (%p37_p0, %s36_s26), 0 }
  0x17   : > { %3019 = sst [smem:[#allocation14_spill]] %s3055_s26  ;;  %s3057_s27 = smov (!%p37_p0, %s39_s27), %s2460_s23 }
  0x18   : > { %s121_s29 = ssub.s32 %s2456_s22, %s3055_s26  ;;  %p132_p2 = scmp.eq.s32.totalorder %s2464_s24, 0 }
  0x19   : > { %p41_p3 = scmp.ge.s32.totalorder %s3057_s27, 2  ;;  %p122_p4 = scmp.eq.s32.totalorder %s121_s29, 0 }
  0x1a   : > { %p133_p5 = por %p132_p2, %p131_p1  ;;  %p137_p6 = scmp.ne.s32.totalorder %s2440_s18, %s2436_s17 }
  0x1b   : > { %s3059_s27 = smov (%p41_p3, %s3057_s27), 0  ;;  %p138_p7 = scmp.eq.s32.totalorder %s2992_s25, 0 }
  0x1c   : > { %3020 = sst [smem:[#allocation15_spill]] %s3059_s27  ;;  %p2075_p8 = scmp.lt.s32.totalorder %s2464_s24, 12 }
  0x1d   : > { %s2587_s30 = scalar_select %p122_p4, %s2444_s19, %s124_s28  }
  0x1e   : > { %s2993_s12 = sand.u32 1, %s2444_s19   ;;  %p2593_p9 = por %p138_p7, %p137_p6 }
  0x1f   : > { %3021 = sst [smem:[#allocation16_spill]] %s2587_s30  ;;  %s2599_s14 = sshll.u32 %s2993_s12, 8 }
  0x20   : > { %s3022_s13 = scalar_select %p2593_p9, 1, 0 }
  0x21   : > { %s2602_s15 = sshll.u32 %s2456_s22, 12  ;;  %p2604_p10 = pnand %p2075_p8, %p133_p5 }
  0x22   : > { %s419_s17 = sand.u32 1, %s2464_s24   ;;  %s3024_s5 = sld [smem:[#allocation21_spill]] }
  0x23   : > { %s423_s12 = scalar_lea.vmem [#allocation4], %s2599_s14  ;;  %s2619_s26 = scalar_lea.sflag [#allocation5], %s419_s17 }
  0x24   : > { %s430_s27 = sshll.u32 %s423_s12, 4  ;;  %p2625_p13 = pneg %p2604_p10  ;;  %s2616_s27 = int_to_ptr.vmem [resolvable:$true] %s430_s27 }
  0x28   : > { %s2613_s25 = scalar_lea.hbm %s3024_s5, %s2602_s15  ;;  %s2309_s12 = scalar_lea.hbm %s3024_s5, 24576 }
  0x29   : > { %s2304_s23 = scalar_lea.hbm %s2613_s25, 4096  ;;  %p2310_p2 = scmp.lt.u32.totalorder %s2613_s25, %s3024_s5 }
  0x2a   : > { %p2305_p12 = scmp.ne.s32.totalorder %s2613_s25, %s2304_s23  ;;  %p2311_p3 = scmp.lt.u32.totalorder %s2309_s12, %s2304_s23 }
  0x2b   : > { %p2313_p5 = scmp.lt.u32.totalorder %s2304_s23, %s2613_s25 }
  0x2c   : > { %p2307_p0 = pnand %p2625_p13, %p2305_p12  ;;  %p2312_p4 = por %p2311_p3, %p2310_p2 }
  0x2e   : > { %p2308_p1 = pneg %p2307_p0  ;;  %p2314_p6 = por %p2313_p5, %p2312_p4 }
  0x30   : > { %p2315_p7 = pnand %p2314_p6, %p2308_p1 }
  0x32   : > { %2318 = shalt.err (!%p2315_p7)
}
  0x33   : > { %s2319_s17 = scalar_lea.vmem %s2616_s27, 4096  ;;  %s2466_s28 = smov [#allocation4]  }
  0x34   : > { %p2320_p8 = scmp.ne.s32.totalorder %s2616_s27, %s2319_s17  ;;  %s2324_s29 = sshll.u32 %s2466_s28, 4  ;;  %s2325_s29 = int_to_ptr.vmem [resolvable:$false] %s2324_s29 }
  0x35   : > { %s2326_s11 = scalar_lea.vmem %s2325_s29, 8192  ;;  %p2327_p11 = scmp.lt.s32.totalorder %s2616_s27, %s2325_s29 }
  0x36   : > { %p2322_p12 = pnand %p2320_p8, %p2625_p13  ;;  %p2328_p9 = scmp.lt.s32.totalorder %s2326_s11, %s2319_s17 }
  0x38   : > { %p2323_p0 = pneg %p2322_p12  ;;  %p2329_p2 = por %p2328_p9, %p2327_p11 }
  0x3a   : > { %p2330_p3 = pnand %p2329_p2, %p2323_p0 }
  0x3c   : > { %2333 = shalt.err (!%p2330_p3)
}
  0x3d   : > { %s2998_s23 = smov 128   ;;  %s3000_s30 = smov 8  }
  0x3e   : > { %2071 = dma.hbm_to_vmem [thread:$0]  (!%p2604_p10), %s2613_s25, 4096, %s2616_s27, %s2619_s26, %s2998_s23, %s2998_s23, %s3000_s30  }
  0x3f   : > { %p487_p9 = scmp.lt.s32.totalorder %s2464_s24, 13  ;;  %p3026_p11 = scmp.ge.s32.totalorder %s2464_s24, 1 }
  0x40   : > { %s3028_s3 = sld [smem:[#allocation19_spill]]  ;;  %s395_s11 = scalar_lea.vmem [#allocation2], %s2599_s14 }
  0x41   : > { %p2655_p1 = pnand %p3026_p11, %p487_p9  ;;  %s402_s5 = sshll.u32 %s395_s11, 4  ;;  %s2666_s5 = int_to_ptr.vmem [resolvable:$true] %s402_s5 }
  0x42   : > { %s3029_s25 = sand.u32 1, %s2444_s19  }
  0x43   : > { %s3027_s12 = scalar_select %p2655_p1, 1, 0 }
  0x44   : > { %s2670_s27 = scalar_lea.sflag [#allocation3], %s3029_s25 }
  0x46   : > { %s2663_s29 = scalar_lea.hbm %s3028_s3, %s2602_s15  ;;  %s2339_s28 = scalar_lea.hbm %s3028_s3, 24576 }
  0x47   : > { %s2334_s23 = scalar_lea.hbm %s2663_s29, 4096  ;;  %p2340_p7 = scmp.lt.u32.totalorder %s2663_s29, %s3028_s3 }
  0x48   : > { %p2335_p4 = scmp.ne.s32.totalorder %s2663_s29, %s2334_s23  ;;  %p2341_p8 = scmp.lt.u32.totalorder %s2339_s28, %s2334_s23 }
  0x49   : > { %p2343_p0 = scmp.lt.u32.totalorder %s2334_s23, %s2663_s29 }
  0x4a   : > { %p2337_p5 = pnand %p2335_p4, %p2625_p13  ;;  %p2342_p12 = por %p2341_p8, %p2340_p7 }
  0x4c   : > { %p2338_p6 = pneg %p2337_p5  ;;  %p2344_p2 = por %p2343_p0, %p2342_p12 }
  0x4e   : > { %p2345_p3 = pnand %p2344_p2, %p2338_p6 }
  0x50   : > { %2348 = shalt.err (!%p2345_p3)
}
  0x51   : > { %s2349_s11 = scalar_lea.vmem %s2666_s5, 4096  ;;  %s2469_s30 = smov [#allocation2]  }
  0x52   : > { %p2350_p9 = scmp.ne.s32.totalorder %s2666_s5, %s2349_s11  ;;  %s2354_s25 = sshll.u32 %s2469_s30, 4  ;;  %s2355_s25 = int_to_ptr.vmem [resolvable:$false] %s2354_s25 }
  0x53   : > { %s2356_s9 = scalar_lea.vmem %s2355_s25, 8192  ;;  %p2357_p5 = scmp.lt.s32.totalorder %s2666_s5, %s2355_s25 }
  0x54   : > { %p2352_p11 = pnand %p2350_p9, %p2625_p13  ;;  %p2358_p1 = scmp.lt.s32.totalorder %s2356_s9, %s2349_s11 }
  0x56   : > { %p2353_p4 = pneg %p2352_p11  ;;  %p2359_p7 = por %p2358_p1, %p2357_p5 }
  0x58   : > { %p2360_p8 = pnand %p2359_p7, %p2353_p4 }
  0x5a   : > { %2363 = shalt.err (!%p2360_p8)
}
  0x5b   : > { %s3030_s10 = smov 8   ;;  %s3031_s23 = smov 128  }
  0x5c   : > { %2068 = dma.hbm_to_vmem [thread:$0]  (!%p2604_p10), %s2663_s29, 4096, %s2666_s5, %s2670_s27, %s3031_s23, %s3031_s23, %s3030_s10  }
  0x5d   : > { %s3032_s7 = sld [smem:[#allocation22_spill]]  ;;  %s451_s11 = scalar_lea.vmem [#allocation6], %s2599_s14 }
  0x5e   : > { %s458_s25 = sshll.u32 %s451_s11, 4  ;;  %s2704_s25 = int_to_ptr.vmem [resolvable:$true] %s458_s25 }
  0x63   : > { %s2701_s30 = scalar_lea.hbm %s3032_s7, %s2602_s15  ;;  %s2369_s29 = scalar_lea.hbm %s3032_s7, 24576 }
  0x64   : > { %s2364_s9 = scalar_lea.hbm %s2701_s30, 4096  ;;  %p2370_p0 = scmp.lt.u32.totalorder %s2701_s30, %s3032_s7 }
  0x65   : > { %p2365_p1 = scmp.ne.s32.totalorder %s2701_s30, %s2364_s9  ;;  %p2371_p2 = scmp.lt.u32.totalorder %s2369_s29, %s2364_s9 }
  0x66   : > { %p2373_p9 = scmp.lt.u32.totalorder %s2364_s9, %s2701_s30 }
  0x67   : > { %p2367_p6 = pnand %p2365_p1, %p2625_p13  ;;  %p2372_p3 = por %p2371_p2, %p2370_p0 }
  0x69   : > { %p2368_p12 = pneg %p2367_p6  ;;  %p2374_p11 = por %p2373_p9, %p2372_p3 }
  0x6b   : > { %p2375_p4 = pnand %p2374_p11, %p2368_p12 }
  0x6d   : > { %2378 = shalt.err (!%p2375_p4)
}
  0x6e   : > { %s2379_s14 = scalar_lea.vmem %s2704_s25, 4096  ;;  %s2470_s3 = smov [#allocation6]  }
  0x6f   : > { %p2380_p5 = scmp.ne.s32.totalorder %s2704_s25, %s2379_s14  ;;  %s2384_s17 = sshll.u32 %s2470_s3, 4  ;;  %s2385_s17 = int_to_ptr.vmem [resolvable:$false] %s2384_s17 }
  0x70   : > { %s2386_s28 = scalar_lea.vmem %s2385_s17, 8192  ;;  %p2387_p1 = scmp.lt.s32.totalorder %s2704_s25, %s2385_s17 }
  0x71   : > { %p2382_p7 = pnand %p2380_p5, %p2625_p13  ;;  %p2388_p6 = scmp.lt.s32.totalorder %s2386_s28, %s2379_s14 }
  0x73   : > { %p2383_p8 = pneg %p2382_p7  ;;  %p2389_p0 = por %p2388_p6, %p2387_p1 }
  0x75   : > { %p2390_p2 = pnand %p2389_p0, %p2383_p8 }
  0x77   : > { %2393 = shalt.err (!%p2390_p2)
}
  0x78   : > { %2074 = dma.hbm_to_vmem [thread:$0]  (!%p2604_p10), %s2701_s30, 4096, %s2704_s25, %s2619_s26, %s3031_s23, %s3031_s23, %s3030_s10  }
  0x79   : > { %p3033_p13 = scmp.ne.s32.totalorder %s3027_s12, 0 }
  0x7a   : > { %s493_s22 = sand.u32 (!%p3033_p13), 1, %s2440_s18   ;;  %p3034_p12 = scmp.ne.s32.totalorder (!%p3033_p13), %s3022_s13, 0 }
  0x7b   : > { %491 = sbr.rel (%p3033_p13) target bundleno = 1261 (0x4ed), region = 64  ;;  %s1894_s11 = sshll.u32 (!%p3033_p13), %s493_s22, 8 }
  0x7c   : > { %s494_s9 = scalar_lea.sflag (!%p3033_p13), [#allocation3], %s493_s22  ;;  %s2734_s5 = scalar_lea.vmem (!%p3033_p13), [#allocation2], %s1894_s11 }
  0x82   : > { %2427 = dma.done.wait (%p3034_p12), %s494_s9, 4096  }
  0x83   : > { %2429 = vsyncadd (%p3034_p12), %s494_s9, 4294963200  ;;  %s3035_s16 = sadd.s32 4294967295, %s2464_s24   ;;  %s2742_s10 = scalar_lea.vmem [#allocation4], %s1894_s11 }
  0x84   : > { %s502_s29 = sand.u32 1, %s3035_s16  }
  0x85   : > { %s503_s26 = scalar_lea.sflag [#allocation5], %s502_s29 }
  0x86   : > { %2431 = dma.done.wait (%p3034_p12), %s503_s26, 8192  }
  0x87   : > { %2433 = vsyncadd (%p3034_p12), %s503_s26, 4294959104  ;;  %p596_p10 = scmp.lt.s32.totalorder %s2452_s21, 1  ;;  %p600_p3 = scmp.lt.s32.totalorder %s2448_s20, 5 }
  0x88   : > { %s3036_s0 = sld [smem:[#allocation17_spill]]  ;;  %s3037_s1 = sld [smem:[#allocation18_spill]] }
  0x89   : > { %s3061_s21 = smov (!%p596_p10, %s2452_s21), 1  ;;  %s3039_s28 = sld [smem:[#allocation24_spill]] }
  0x8a   : > { %s2752_s12 = scalar_select %p600_p3, %s2448_s20, 5 }
  0x8b   : > { %s1897_s23 = sshll.u32 %s3061_s21, 3  ;;  %s3040_s9 = sld [smem:[#allocation23_spill]] }
  0x8c   : > { %s2029_s13 = sshll.u32 %s2752_s12, 5  ;;  %s2762_s17 = sshll.u32 %s2752_s12, 1 }
  0x8d   : > { %s616_s25 = scalar_lea.vmem %s2986_s6, %s2762_s17  ;;  %s620_s14 = scalar_lea.vmem %s2988_s8, %s2762_s17 }
  0x8e   : > { %s599_s27 = scalar_lea.vmem %s3036_s0, %s1897_s23  ;;  %s604_s3 = scalar_lea.vmem %s3037_s1, %s2029_s13 }
  0x8f   : > { %s2030_s0 = sshll.u32 %s2752_s12, 7  ;;  %s628_s22 = scalar_lea.vmem %s3039_s28, %s2752_s12 }
  0x90   : > { %s3041_s29 = sld [smem:[#allocation25_spill]]  ;;  %s2795_s26 = scalar_lea.vmem [#allocation6], %s1894_s11 }
  0x91   : > { %s2788_s24 = scalar_lea.vmem %s3040_s9, %s2030_s0  ;;  %p1907_p9 = scmp.ne.s32.totalorder %s2448_s20, 0 }
  0x92   : > { %v638_v0 = vld [vmem:[%s599_s27] sm:$0xff] (!%p1907_p9)  ;;  %vm639_vm0 = vcmask (!%p1907_p9), 121856  }
  0x93   : > { %637 = sbr.rel (%p1907_p9) target bundleno = 154 (0x9a), region = 80 }
  0x96   : > { %s2793_s4 = scalar_lea.vmem %s3041_s29, %s1897_s23 }
  0x97   : > { %640 = vst.msk [vmem:[%s2793_s4] sm:$0xff] (!%p1907_p9), %vm639_vm0, %v638_v0 }
  0x9a PF: > { %v643_v1 = vld [vmem:[%s604_s3 + $0x8] sm:$0xff]  ;;  %v645_v2 = vld [vmem:[%s604_s3 + $0x18] sm:$0x7f]  ;;  %vm662_vm1 = vcmask 1046528   ;;  %v642_v3 = vld [vmem:[%s604_s3] sm:$0xff]  ;;  %vm2471_vm2 = vmmov 1   ;;  %s3042_s7 = scalar_lea.vmem %s2982_s2, %s2762_s17 }
  0x9b   : > { %v2053_v4 = vpack.c.bf16 %v645_v2, %v643_v1  ;;  %vm2054_vm3 = vmpackc.low %vm662_vm1, %vm2471_vm2  ;;  %v644_v5 = vld [vmem:[%s604_s3 + $0x10] sm:$0x7f]  ;;  %v2472_v7 = vmov 0.0   ;;  %v2144_v8 = vld [vmem:[%s2734_s5 + $0x4] ss:$8 sps:$4 sm:$0xff]   ;;  %vm658_vm4 = vcmask 121856  }
  0x9c   : > { %v2056_v6 = vpack.c.bf16 %v644_v5, %v642_v3  ;;  %733 = vmatprep.mubr.f32.mxu0 %v2472_v7  ;;  %v2146_v9 = vld [vmem:[%s2734_s5] ss:$8 sps:$4 sm:$0xff]   ;;  %948 = vmatprep.subr.bf16.mxu1 %v2144_v8  ;;  %v2147_v11 = vld [vmem:[%s2734_s5 + $0x14] ss:$8 sps:$4 sm:$0xff]   ;;  %v2149_v12 = vld [vmem:[%s2734_s5 + $0x10] ss:$8 sps:$4 sm:$0xff]   ;;  %v648_v5 = vlaneseq }
  0x9d   : > { %2055 = vmatprep.subr.msk.bf16.mxu0 %vm2054_vm3, %v2053_v4  ;;  %949 = vmatpush1.bf16.msra.mxu1 %v2146_v9  ;;  %v2150_v13 = vld [vmem:[%s2734_s5 + $0x24] ss:$8 sps:$4 sm:$0xff]   ;;  %v2152_v14 = vld [vmem:[%s2734_s5 + $0x20] ss:$8 sps:$4 sm:$0xff]   ;;  %v2153_v15 = vld [vmem:[%s2734_s5 + $0x34] ss:$8 sps:$4 sm:$0xff]  }
  0x9e   : > { %2058 = vmatpush1.bf16.msk.msra.mxu0 %vm2054_vm3, %v2056_v6  ;;  %v2802_v10 = vld [vmem:[%s2793_s4] sm:$0xff]  ;;  %950 = vmatprep.subr.bf16.mxu1 %v2147_v11  ;;  %v2155_v16 = vld [vmem:[%s2734_s5 + $0x30] ss:$8 sps:$4 sm:$0xff]   ;;  %v2159_v19 = vld [vmem:[%s2734_s5 + $0x54] ss:$8 sps:$4 sm:$0xff]   ;;  %v649_v6 = vshrl.u32 %v648_v5, 7 }
  0x9f   : > { %v2156_v17 = vld [vmem:[%s2734_s5 + $0x44] ss:$8 sps:$4 sm:$0xff]   ;;  %v2158_v18 = vld [vmem:[%s2734_s5 + $0x40] ss:$8 sps:$4 sm:$0xff]   ;;  %v2161_v20 = vld [vmem:[%s2734_s5 + $0x50] ss:$8 sps:$4 sm:$0xff]  }
  0xa0   : > { %v2162_v21 = vld [vmem:[%s2734_s5 + $0x64] ss:$8 sps:$4 sm:$0xff]   ;;  %v2164_v22 = vld [vmem:[%s2734_s5 + $0x60] ss:$8 sps:$4 sm:$0xff]   ;;  %v2165_v23 = vld [vmem:[%s2734_s5 + $0x74] ss:$8 sps:$4 sm:$0xff]  }
  0xa1   : > { %1910 = vmatmul.mubr.msk.f32.vlgmr.msra.gmra.mrb[0].mxu0 %vm658_vm4, %v2802_v10  ;;  %951 = vmatpush1.bf16.msra.mxu1 %v2149_v12  ;;  %v2167_v24 = vld [vmem:[%s2734_s5 + $0x70] ss:$8 sps:$4 sm:$0xff]   ;;  %v2168_v25 = vld [vmem:[%s2734_s5 + $0x84] ss:$8 sps:$4 sm:$0xff]   ;;  %v2170_v26 = vld [vmem:[%s2734_s5 + $0x80] ss:$8 sps:$4 sm:$0xff]  }
  0xa2   : > { %952 = vmatprep.subr.bf16.mxu1 %v2150_v13  ;;  %v2171_v27 = vld [vmem:[%s2734_s5 + $0x94] ss:$8 sps:$4 sm:$0xff]   ;;  %v2173_v28 = vld [vmem:[%s2734_s5 + $0x90] ss:$8 sps:$4 sm:$0xff]   ;;  %v2174_v29 = vld [vmem:[%s2734_s5 + $0xa4] ss:$8 sps:$4 sm:$0xff]  }
  0xa3   : > { %v2176_v30 = vld [vmem:[%s2734_s5 + $0xa0] ss:$8 sps:$4 sm:$0xff]   ;;  %v2177_v31 = vld [vmem:[%s2734_s5 + $0xb4] ss:$8 sps:$4 sm:$0xff]   ;;  %v2179_v32 = vld [vmem:[%s2734_s5 + $0xb0] ss:$8 sps:$4 sm:$0xff]  }
  0xa4   : > { %v2180_v33 = vld [vmem:[%s2734_s5 + $0xc4] ss:$8 sps:$4 sm:$0xff]   ;;  %v2182_v34 = vld [vmem:[%s2734_s5 + $0xc0] ss:$8 sps:$4 sm:$0xff]   ;;  %v2183_v35 = vld [vmem:[%s2734_s5 + $0xd4] ss:$8 sps:$4 sm:$0xff]  }
  0xa5   : > { %953 = vmatpush1.bf16.msra.mxu1 %v2152_v14  ;;  %v2185_v36 = vld [vmem:[%s2734_s5 + $0xd0] ss:$8 sps:$4 sm:$0xff]   ;;  %v2186_v37 = vld [vmem:[%s2734_s5 + $0xe4] ss:$8 sps:$4 sm:$0xff]   ;;  %v2188_v38 = vld [vmem:[%s2734_s5 + $0xe0] ss:$8 sps:$4 sm:$0xff]  }
  0xa6   : > { %954 = vmatprep.subr.bf16.mxu1 %v2153_v15  ;;  %v2189_v39 = vld [vmem:[%s2734_s5 + $0xf4] ss:$8 sps:$4 sm:$0xff]   ;;  %v2191_v40 = vld [vmem:[%s2734_s5 + $0xf0] ss:$8 sps:$4 sm:$0xff]   ;;  %v2192_v41 = vld [vmem:[%s2742_s10] ss:$8 sps:$4 sm:$0xff]  }
  0xa7   : > { %v2194_v42 = vld [vmem:[%s2742_s10 + $0x4] ss:$8 sps:$4 sm:$0xff]   ;;  %v2197_v43 = vld [vmem:[%s2742_s10 + $0x14] ss:$8 sps:$4 sm:$0xff]   ;;  %v2195_v44 = vld [vmem:[%s2742_s10 + $0x10] ss:$8 sps:$4 sm:$0xff]  }
  0xa8   : > { %1197 = vmatprep.subr.bf16.mxu0 %v2194_v42  ;;  %v2200_v45 = vld [vmem:[%s2742_s10 + $0x24] ss:$8 sps:$4 sm:$0xff]   ;;  %v2198_v46 = vld [vmem:[%s2742_s10 + $0x20] ss:$8 sps:$4 sm:$0xff]   ;;  %v2203_v47 = vld [vmem:[%s2742_s10 + $0x34] ss:$8 sps:$4 sm:$0xff]  }
  0xa9   : > { %955 = vmatpush1.bf16.msra.mxu1 %v2155_v16  ;;  %1198 = vmatpush1.bf16.msra.mxu0 %v2192_v41  ;;  %v2201_v48 = vld [vmem:[%s2742_s10 + $0x30] ss:$8 sps:$4 sm:$0xff]   ;;  %v2206_v49 = vld [vmem:[%s2742_s10 + $0x44] ss:$8 sps:$4 sm:$0xff]   ;;  %v2204_v50 = vld [vmem:[%s2742_s10 + $0x40] ss:$8 sps:$4 sm:$0xff]  }
  0xaa   : > { %956 = vmatprep.subr.bf16.mxu1 %v2156_v17  ;;  %1199 = vmatprep.subr.bf16.mxu0 %v2197_v43  ;;  %v2209_v51 = vld [vmem:[%s2742_s10 + $0x54] ss:$8 sps:$4 sm:$0xff]   ;;  %v2207_v52 = vld [vmem:[%s2742_s10 + $0x50] ss:$8 sps:$4 sm:$0xff]   ;;  %v2212_v53 = vld [vmem:[%s2742_s10 + $0x64] ss:$8 sps:$4 sm:$0xff]  }
  0xab   : > { %v2210_v54 = vld [vmem:[%s2742_s10 + $0x60] ss:$8 sps:$4 sm:$0xff]   ;;  %v2215_v55 = vld [vmem:[%s2742_s10 + $0x74] ss:$8 sps:$4 sm:$0xff]   ;;  %v2213_v56 = vld [vmem:[%s2742_s10 + $0x70] ss:$8 sps:$4 sm:$0xff]  }
  0xac   : > { %v2218_v57 = vld [vmem:[%s2742_s10 + $0x84] ss:$8 sps:$4 sm:$0xff]   ;;  %v2216_v58 = vld [vmem:[%s2742_s10 + $0x80] ss:$8 sps:$4 sm:$0xff]   ;;  %v2221_v59 = vld [vmem:[%s2742_s10 + $0x94] ss:$8 sps:$4 sm:$0xff]  }
  0xad   : > { %957 = vmatpush1.bf16.msra.mxu1 %v2158_v18  ;;  %1200 = vmatpush1.bf16.msra.mxu0 %v2195_v44  ;;  %v2219_v60 = vld [vmem:[%s2742_s10 + $0x90] ss:$8 sps:$4 sm:$0xff]   ;;  %v2224_v61 = vld [vmem:[%s2742_s10 + $0xa4] ss:$8 sps:$4 sm:$0xff]   ;;  %v2222_v62 = vld [vmem:[%s2742_s10 + $0xa0] ss:$8 sps:$4 sm:$0xff]  }
  0xae   : > { %958 = vmatprep.subr.bf16.mxu1 %v2159_v19  ;;  %1201 = vmatprep.subr.bf16.mxu0 %v2200_v45  ;;  %v2227_v63 = vld [vmem:[%s2742_s10 + $0xb4] ss:$8 sps:$4 sm:$0xff]   ;;  %v2225_v0 = vld [vmem:[%s2742_s10 + $0xb0] ss:$8 sps:$4 sm:$0xff]   ;;  %v2230_v1 = vld [vmem:[%s2742_s10 + $0xc4] ss:$8 sps:$4 sm:$0xff]  }
  0xaf   : > { %v2228_v2 = vld [vmem:[%s2742_s10 + $0xc0] ss:$8 sps:$4 sm:$0xff]   ;;  %v2233_v3 = vld [vmem:[%s2742_s10 + $0xd4] ss:$8 sps:$4 sm:$0xff]   ;;  %v2231_v4 = vld [vmem:[%s2742_s10 + $0xd0] ss:$8 sps:$4 sm:$0xff]  }
  0xb0   : > { %v2864_v7 = vsub.s32 0, %v649_v6  ;;  %v646_v8 = vld [vmem:[%s3042_s7] sm:$0x3]  ;;  %v2871_v9 = vsub.s32 1, %v649_v6  ;;  %v2266_v41 = vld [vmem:[%s2795_s26 + $0x84] ss:$8 sps:$4 sm:$0xff]  }
  0xb1   : > { %959 = vmatpush1.bf16.msra.mxu1 %v2161_v20  ;;  %1202 = vmatpush1.bf16.msra.mxu0 %v2198_v46  ;;  %v2264_v42 = vld [vmem:[%s2795_s26 + $0x80] ss:$8 sps:$4 sm:$0xff]   ;;  %v2269_v43 = vld [vmem:[%s2795_s26 + $0x94] ss:$8 sps:$4 sm:$0xff]   ;;  %v2267_v44 = vld [vmem:[%s2795_s26 + $0x90] ss:$8 sps:$4 sm:$0xff]  }
  0xb2   : > { %960 = vmatprep.subr.bf16.mxu1 %v2162_v21  ;;  %1203 = vmatprep.subr.bf16.mxu0 %v2203_v47  ;;  %v651_v11 = vrot.slane %v646_v8, %v2864_v7  ;;  %v655_v12 = vrot.slane %v646_v8, %v2871_v9  ;;  %v2236_v21 = vld [vmem:[%s2742_s10 + $0xe4] ss:$8 sps:$4 sm:$0xff]   ;;  %v2270_v46 = vld [vmem:[%s2795_s26 + $0xa0] ss:$8 sps:$4 sm:$0xff]   ;;  %v2275_v47 = vld [vmem:[%s2795_s26 + $0xb4] ss:$8 sps:$4 sm:$0xff]  }
  0xb3   : > { %v2272_v45 = vld [vmem:[%s2795_s26 + $0xa4] ss:$8 sps:$4 sm:$0xff]   ;;  %s3043_s20 = sld [smem:[#allocation20_spill]]  ;;  %v2285_v5 = vld [vmem:[%s2795_s26 + $0xf0] ss:$8 sps:$4 sm:$0xff]  }
  0xb4   : > { %v2288_v6 = vld [vmem:[%s2788_s24 + $0x40] sm:$0xff]  }
  0xb5   : > { %961 = vmatpush1.bf16.msra.mxu1 %v2164_v22  ;;  %1204 = vmatpush1.bf16.msra.mxu0 %v2201_v48  ;;  %v2234_v22 = vld [vmem:[%s2742_s10 + $0xe0] ss:$8 sps:$4 sm:$0xff]   ;;  %v2273_v48 = vld [vmem:[%s2795_s26 + $0xb0] ss:$8 sps:$4 sm:$0xff]  }
  0xb6   : > { %962 = vmatprep.subr.bf16.mxu1 %v2165_v23  ;;  %1205 = vmatprep.subr.bf16.mxu0 %v2206_v49  ;;  %v2239_v23 = vld [vmem:[%s2742_s10 + $0xf4] ss:$8 sps:$4 sm:$0xff]   ;;  %v2278_v49 = vld [vmem:[%s2795_s26 + $0xc4] ss:$8 sps:$4 sm:$0xff]  }
  0xb7   : > { %v2289_v8 = vld [vmem:[%s2788_s24] sm:$0xff]  }
  0xb9   : > { %963 = vmatpush1.bf16.msra.mxu1 %v2167_v24  ;;  %1206 = vmatpush1.bf16.msra.mxu0 %v2204_v50  ;;  %v2237_v24 = vld [vmem:[%s2742_s10 + $0xf0] ss:$8 sps:$4 sm:$0xff]   ;;  %v2276_v50 = vld [vmem:[%s2795_s26 + $0xc0] ss:$8 sps:$4 sm:$0xff]   ;;  %s3044_s11 = scalar_lea.vmem %s3043_s20, %s2762_s17 }
  0xba   : > { %964 = vmatprep.subr.bf16.mxu1 %v2168_v25  ;;  %1207 = vmatprep.subr.bf16.mxu0 %v2209_v51  ;;  %v2240_v25 = vld [vmem:[%s2795_s26] ss:$8 sps:$4 sm:$0xff]   ;;  %v2281_v51 = vld [vmem:[%s2795_s26 + $0xd4] ss:$8 sps:$4 sm:$0xff]  }
  0xbd   : > { %965 = vmatpush1.bf16.msra.mxu1 %v2170_v26  ;;  %1208 = vmatpush1.bf16.msra.mxu0 %v2207_v52  ;;  %v2242_v26 = vld [vmem:[%s2795_s26 + $0x4] ss:$8 sps:$4 sm:$0xff]   ;;  %v2279_v52 = vld [vmem:[%s2795_s26 + $0xd0] ss:$8 sps:$4 sm:$0xff]  }
  0xbe   : > { %966 = vmatprep.subr.bf16.mxu1 %v2171_v27  ;;  %1209 = vmatprep.subr.bf16.mxu0 %v2212_v53  ;;  %v2245_v27 = vld [vmem:[%s2795_s26 + $0x14] ss:$8 sps:$4 sm:$0xff]   ;;  %v776_v53 = vld [vmem:[%s3044_s11] sm:$0x3] }
  0xc1   : > { %967 = vmatpush1.bf16.msra.mxu1 %v2173_v28  ;;  %1210 = vmatpush1.bf16.msra.mxu0 %v2210_v54  ;;  %v2243_v28 = vld [vmem:[%s2795_s26 + $0x10] ss:$8 sps:$4 sm:$0xff]   ;;  %v781_v54 = vrot.slane %v776_v53, %v2864_v7 }
  0xc2   : > { %968 = vmatprep.subr.bf16.mxu1 %v2174_v29  ;;  %1211 = vmatprep.subr.bf16.mxu0 %v2215_v55  ;;  %v2248_v29 = vld [vmem:[%s2795_s26 + $0x24] ss:$8 sps:$4 sm:$0xff]   ;;  %v785_v55 = vrot.slane %v776_v53, %v2871_v9 }
  0xc5   : > { %969 = vmatpush1.bf16.msra.mxu1 %v2176_v30  ;;  %1212 = vmatpush1.bf16.msra.mxu0 %v2213_v56  ;;  %v2246_v30 = vld [vmem:[%s2795_s26 + $0x20] ss:$8 sps:$4 sm:$0xff]  }
  0xc6   : > { %970 = vmatprep.subr.bf16.mxu1 %v2177_v31  ;;  %1213 = vmatprep.subr.bf16.mxu0 %v2218_v57  ;;  %v2251_v31 = vld [vmem:[%s2795_s26 + $0x34] ss:$8 sps:$4 sm:$0xff]  }
  0xc9   : > { %971 = vmatpush1.bf16.msra.mxu1 %v2179_v32  ;;  %1214 = vmatpush1.bf16.msra.mxu0 %v2216_v58  ;;  %v2249_v32 = vld [vmem:[%s2795_s26 + $0x30] ss:$8 sps:$4 sm:$0xff]  }
  0xca   : > { %972 = vmatprep.subr.bf16.mxu1 %v2180_v33  ;;  %1215 = vmatprep.subr.bf16.mxu0 %v2221_v59  ;;  %v2254_v33 = vld [vmem:[%s2795_s26 + $0x44] ss:$8 sps:$4 sm:$0xff]  }
  0xcd   : > { %973 = vmatpush1.bf16.msra.mxu1 %v2182_v34  ;;  %1216 = vmatpush1.bf16.msra.mxu0 %v2219_v60  ;;  %v2252_v34 = vld [vmem:[%s2795_s26 + $0x40] ss:$8 sps:$4 sm:$0xff]  }
  0xce   : > { %974 = vmatprep.subr.bf16.mxu1 %v2183_v35  ;;  %1217 = vmatprep.subr.bf16.mxu0 %v2224_v61  ;;  %v2257_v35 = vld [vmem:[%s2795_s26 + $0x54] ss:$8 sps:$4 sm:$0xff]  }
  0xd1   : > { %975 = vmatpush1.bf16.msra.mxu1 %v2185_v36  ;;  %1218 = vmatpush1.bf16.msra.mxu0 %v2222_v62  ;;  %v2255_v36 = vld [vmem:[%s2795_s26 + $0x50] ss:$8 sps:$4 sm:$0xff]  }
  0xd2   : > { %976 = vmatprep.subr.bf16.mxu1 %v2186_v37  ;;  %1219 = vmatprep.subr.bf16.mxu0 %v2227_v63  ;;  %v2260_v37 = vld [vmem:[%s2795_s26 + $0x64] ss:$8 sps:$4 sm:$0xff]  }
  0xd5   : > { %977 = vmatpush1.bf16.msra.mxu1 %v2188_v38  ;;  %1220 = vmatpush1.bf16.msra.mxu0 %v2225_v0  ;;  %v2258_v38 = vld [vmem:[%s2795_s26 + $0x60] ss:$8 sps:$4 sm:$0xff]  }
  0xd6   : > { %978 = vmatprep.subr.bf16.mxu1 %v2189_v39  ;;  %1221 = vmatprep.subr.bf16.mxu0 %v2230_v1  ;;  %v2263_v39 = vld [vmem:[%s2795_s26 + $0x74] ss:$8 sps:$4 sm:$0xff]  }
  0xd9   : > { %979 = vmatpush1.bf16.msra.mxu1 %v2191_v40  ;;  %1222 = vmatpush1.bf16.msra.mxu0 %v2228_v2  ;;  %v2261_v40 = vld [vmem:[%s2795_s26 + $0x70] ss:$8 sps:$4 sm:$0xff]   ;;  %v2284_v2 = vld [vmem:[%s2795_s26 + $0xe4] ss:$8 sps:$4 sm:$0xff]  }
  0xda   : > { %1223 = vmatprep.subr.bf16.mxu0 %v2233_v3  ;;  %1446 = vmatprep.subr.bf16.mxu1 %v2242_v26  ;;  %v2282_v3 = vld [vmem:[%s2795_s26 + $0xe0] ss:$8 sps:$4 sm:$0xff]  }
  0xdd   : > { %1224 = vmatpush1.bf16.msra.mxu0 %v2231_v4  ;;  %v2287_v4 = vld [vmem:[%s2795_s26 + $0xf4] ss:$8 sps:$4 sm:$0xff]  }
  0xde   : > { %1225 = vmatprep.subr.bf16.mxu0 %v2236_v21  ;;  %v1025_v21 = vld [vmem:[%s616_s25] sm:$0x3] }
  0xe1   : > { %1226 = vmatpush1.bf16.msra.mxu0 %v2234_v22  ;;  %v1030_v22 = vrot.slane %v1025_v21, %v2864_v7 }
  0xe2   : > { %1227 = vmatprep.subr.bf16.mxu0 %v2239_v23  ;;  %v1034_v23 = vrot.slane %v1025_v21, %v2871_v9 }
  0xe5   : > { %1228 = vmatpush1.bf16.msra.mxu0 %v2237_v24 }
  0xe6   : > { %2031 = vmatprep.subr.bf16.mxu0 %v2288_v6 }
 0x174   : > { %v735_v13 = vpop.f32.mrb[0].mxu0 }
 0x175   : > { %v736_v14 = vadd.f32 %v735_v13, %v651_v11  ;;  %v737_v15 = vpop.f32.mrb[1].mxu0  ;;  %v2290_v11 = vld [vmem:[%s2788_s24 + $0x48] sm:$0xff]   ;;  %v2292_v13 = vld [vmem:[%s2788_s24 + $0x50] sm:$0xff]  }
 0x176   : > { %v738_v16 = vadd.f32 %v737_v15, %v655_v12  ;;  %v2291_v12 = vld [vmem:[%s2788_s24 + $0x8] sm:$0xff]   ;;  %v2294_v15 = vld [vmem:[%s2788_s24 + $0x58] sm:$0xff]  }
 0x177   : > { %v740_v17 = vmax.f32 %v736_v14, 0.0  ;;  %v2293_v14 = vld [vmem:[%s2788_s24 + $0x10] sm:$0xff]  }
 0x178   : > { %v741_v18 = vmax.f32 %v738_v16, 0.0  ;;  %v2295_v16 = vld [vmem:[%s2788_s24 + $0x18] sm:$0xff]  }
 0x179   : > { %v742_v20 = vpack.c.bf16 %v740_v17, %v740_v17  ;;  %v2296_v17 = vld [vmem:[%s2788_s24 + $0x60] sm:$0xff]  }
 0x17a   : > { %v743_v19 = vpack.c.bf16 %v741_v18, %v741_v18  ;;  %v2297_v18 = vld [vmem:[%s2788_s24 + $0x20] sm:$0xff]  }
 0x17c   : > { %980 = vmatprep.mubr.bf16.mxu1 %v743_v19  ;;  %v2298_v19 = vld [vmem:[%s2788_s24 + $0x68] sm:$0xff]  }
 0x17d   : > { %981 = vmatmul.mubr.bf16.vlgmr.msra.gmra.mrb[0].mxu1 %v742_v20  ;;  %v2299_v20 = vld [vmem:[%s2788_s24 + $0x28] sm:$0xff]  }
 0x17e   : > { %1447 = vmatpush1.bf16.msra.mxu1 %v2240_v25 }
 0x17f   : > { %1448 = vmatprep.subr.bf16.mxu1 %v2245_v27 }
 0x182   : > { %1449 = vmatpush1.bf16.msra.mxu1 %v2243_v28 }
 0x183   : > { %1450 = vmatprep.subr.bf16.mxu1 %v2248_v29 }
 0x186   : > { %1451 = vmatpush1.bf16.msra.mxu1 %v2246_v30 }
 0x187   : > { %1452 = vmatprep.subr.bf16.mxu1 %v2251_v31 }
 0x18a   : > { %1453 = vmatpush1.bf16.msra.mxu1 %v2249_v32 }
 0x18b   : > { %1454 = vmatprep.subr.bf16.mxu1 %v2254_v33 }
 0x18e   : > { %1455 = vmatpush1.bf16.msra.mxu1 %v2252_v34  ;;  %v2300_v34 = vld [vmem:[%s2788_s24 + $0x70] sm:$0xff]  }
 0x18f   : > { %1456 = vmatprep.subr.bf16.mxu1 %v2257_v35  ;;  %v2301_v35 = vld [vmem:[%s2788_s24 + $0x30] sm:$0xff]  }
 0x192   : > { %1457 = vmatpush1.bf16.msra.mxu1 %v2255_v36  ;;  %v2302_v36 = vld [vmem:[%s2788_s24 + $0x78] sm:$0xff]  }
 0x193   : > { %1458 = vmatprep.subr.bf16.mxu1 %v2260_v37  ;;  %v2303_v37 = vld [vmem:[%s2788_s24 + $0x38] sm:$0xff]  }
 0x196   : > { %1459 = vmatpush1.bf16.msra.mxu1 %v2258_v38  ;;  %v1274_v38 = vld [vmem:[%s620_s14] sm:$0x3] }
 0x197   : > { %1460 = vmatprep.subr.bf16.mxu1 %v2263_v39  ;;  %v1279_v39 = vrot.slane %v1274_v38, %v2864_v7  ;;  %v2007_v7 = vld [vmem:[%s628_s22] ss:$0 sm:$0xff] }
 0x19a   : > { %1461 = vmatpush1.bf16.msra.mxu1 %v2261_v40  ;;  %v1283_v40 = vrot.slane %v1274_v38, %v2871_v9 }
 0x19b   : > { %1462 = vmatprep.subr.bf16.mxu1 %v2266_v41 }
 0x19e   : > { %1463 = vmatpush1.bf16.msra.mxu1 %v2264_v42 }
 0x19f   : > { %1464 = vmatprep.subr.bf16.mxu1 %v2269_v43 }
 0x1a2   : > { %1465 = vmatpush1.bf16.msra.mxu1 %v2267_v44 }
 0x1a3   : > { %1466 = vmatprep.subr.bf16.mxu1 %v2272_v45 }
 0x1a6   : > { %1467 = vmatpush1.bf16.msra.mxu1 %v2270_v46 }
 0x1a7   : > { %1468 = vmatprep.subr.bf16.mxu1 %v2275_v47 }
 0x1aa   : > { %1469 = vmatpush1.bf16.msra.mxu1 %v2273_v48 }
 0x1ab   : > { %1470 = vmatprep.subr.bf16.mxu1 %v2278_v49 }
 0x1ae   : > { %1471 = vmatpush1.bf16.msra.mxu1 %v2276_v50 }
 0x1af   : > { %1472 = vmatprep.subr.bf16.mxu1 %v2281_v51 }
 0x1b2   : > { %1473 = vmatpush1.bf16.msra.mxu1 %v2279_v52 }
 0x1b3   : > { %1474 = vmatprep.subr.bf16.mxu1 %v2284_v2 }
 0x1b6   : > { %1475 = vmatpush1.bf16.msra.mxu1 %v2282_v3 }
 0x1b7   : > { %1476 = vmatprep.subr.bf16.mxu1 %v2287_v4 }
 0x1ba   : > { %1477 = vmatpush1.bf16.msra.mxu1 %v2285_v5 }
 0x250   : > { %v982_v56 = vpop.f32.mrb[0].mxu1 }
 0x251   : > { %v983_v57 = vadd.f32 %v982_v56, %v781_v54  ;;  %v984_v58 = vpop.f32.mrb[1].mxu1 }
 0x252   : > { %v985_v59 = vadd.f32 %v984_v58, %v785_v55  ;;  %v986_v60 = vpop.f32.mrb[2].mxu1 }
 0x253   : > { %v989_v61 = vmax.f32 %v983_v57, 0.0  ;;  %v987_v62 = vpop.f32.mrb[3].mxu1 }
 0x254   : > { %v990_v63 = vmax.f32 %v985_v59, 0.0 }
 0x255   : > { %v991_v1 = vpack.c.bf16 %v989_v61, %v989_v61 }
 0x256   : > { %v992_v0 = vpack.c.bf16 %v990_v63, %v990_v63 }
 0x258   : > { %1229 = vmatprep.mubr.bf16.mxu0 %v992_v0 }
 0x259   : > { %1230 = vmatmul.mubr.bf16.vlgmr.msra.gmra.mrb[4].mxu0 %v991_v1 }
 0x25a   : > { %2032 = vmatpush3.bf16.msra.mxu0 %v2289_v8 }
 0x25b   : > { %2033 = vmatprep.subr.bf16.mxu0 %v2290_v11 }
 0x25e   : > { %2034 = vmatpush3.bf16.msra.mxu0 %v2291_v12 }
 0x25f   : > { %2035 = vmatprep.subr.bf16.mxu0 %v2292_v13 }
 0x262   : > { %2036 = vmatpush3.bf16.msra.mxu0 %v2293_v14 }
 0x263   : > { %2037 = vmatprep.subr.bf16.mxu0 %v2294_v15 }
 0x266   : > { %2038 = vmatpush3.bf16.msra.mxu0 %v2295_v16 }
 0x267   : > { %2039 = vmatprep.subr.bf16.mxu0 %v2296_v17 }
 0x26a   : > { %2040 = vmatpush3.bf16.msra.mxu0 %v2297_v18 }
 0x26b   : > { %2041 = vmatprep.subr.bf16.mxu0 %v2298_v19 }
 0x26e   : > { %2042 = vmatpush3.bf16.msra.mxu0 %v2299_v20 }
 0x26f   : > { %2043 = vmatprep.subr.bf16.mxu0 %v2300_v34 }
 0x272   : > { %2044 = vmatpush3.bf16.msra.mxu0 %v2301_v35 }
 0x273   : > { %2045 = vmatprep.subr.bf16.mxu0 %v2302_v36 }
 0x276   : > { %2046 = vmatpush3.bf16.msra.mxu0 %v2303_v37 }
 0x32c   : > { %v1231_v24 = vpop.f32.mrb[4].mxu0 }
 0x32d   : > { %v1232_v25 = vadd.f32 %v1231_v24, %v1030_v22  ;;  %v1233_v26 = vpop.f32.mrb[5].mxu0 }
 0x32e   : > { %v1234_v27 = vadd.f32 %v1233_v26, %v1034_v23  ;;  %v1235_v28 = vpop.f32.mrb[6].mxu0 }
 0x32f   : > { %v1238_v29 = vmax.f32 %v1232_v25, 0.0  ;;  %v1236_v30 = vpop.f32.mrb[7].mxu0 }
 0x330   : > { %v1239_v31 = vmax.f32 %v1234_v27, 0.0 }
 0x331   : > { %v1240_v33 = vpack.c.bf16 %v1238_v29, %v1238_v29 }
 0x332   : > { %v1241_v32 = vpack.c.bf16 %v1239_v31, %v1239_v31 }
 0x334   : > { %1478 = vmatprep.mubr.bf16.mxu1 %v1241_v32 }
 0x335   : > { %1479 = vmatmul.mubr.bf16.vlgmr.msra.gmra.mrb[4].mxu1 %v1240_v33 }
 0x408   : > { %v1480_v41 = vpop.f32.mrb[4].mxu1 }
 0x409   : > { %v1481_v42 = vadd.f32 %v1480_v41, %v1279_v39  ;;  %v1482_v43 = vpop.f32.mrb[5].mxu1 }
 0x40a   : > { %v1483_v44 = vadd.f32 %v1482_v43, %v1283_v40  ;;  %v1484_v45 = vpop.f32.mrb[6].mxu1 }
 0x40b   : > { %v1487_v46 = vmax.f32 %v1481_v42, 0.0  ;;  %v1485_v47 = vpop.f32.mrb[7].mxu1 }
 0x40c   : > { %v1488_v48 = vmax.f32 %v1483_v44, 0.0 }
 0x40d   : > { %v1489_v50 = vpack.c.bf16 %v1487_v46, %v1487_v46 }
 0x40e   : > { %v1490_v49 = vpack.c.bf16 %v1488_v48, %v1488_v48 }
 0x410   : > { %1658 = vmatprep.mubr.bf16.mxu0 %v1490_v49 }
 0x411   : > { %1659 = vmatmul.mubr.bf16.vlgmr.msra.gmra.mrb[8].mxu0 %v1489_v50 }
 0x4e4   : > { %v2047_v51 = vpop.f32.mrb[8].mxu0 }
 0x4e5   : > { %v2048_v9 = vpop.f32.mrb[9].mxu0 }
 0x4e6   : > { %v2049_v52 = vadd.f32 %v2048_v9, %v2047_v51  ;;  %v2050_v53 = vpop.f32.mrb[10].mxu0 }
 0x4e7   : > { %v2051_v54 = vpop.f32.mrb[11].mxu0 }
 0x4e8   : > { %v1661_v55 = vadd.f32 %v2049_v52, %v2007_v7 }
 0x4ea   : > { %v1666_v56 = vadd.f32 %v1661_v55, %v2802_v10 }
 0x4ec   : > { %1667 = vst.msk [vmem:[%s2793_s4] sm:$0xff] %vm658_vm4, %v1666_v56 }
 0x4ed PF: > { %s3046_s9 = sld [smem:[#allocation13_spill]]  ;;  %s3047_s17 = sld [smem:[#allocation9_spill]] }
 0x4ee   : > { %s3048_s18 = sld [smem:[#allocation10_spill]]  ;;  %s3049_s19 = sld [smem:[#allocation16_spill]] }
 0x4ef   : > { %s3050_s20 = sld [smem:[#allocation11_spill]]  ;;  %s3051_s21 = sld [smem:[#allocation12_spill]] }
 0x4f0   : > { %s3052_s22 = sld [smem:[#allocation14_spill]]  ;;  %s3053_s23 = sld [smem:[#allocation15_spill]] }
 0x4f3   : > { %s27_s24 = sadd.s32 1, %s3046_s9  }
 0x4f4   : > { %p24_p11 = scmp.ge.s32.totalorder %s27_s24, 14  }
 0x4f6   :  { %26 = sbr.rel (!%p24_p11) target bundleno = 17 (0x11), region = 156 }
 0x4fd   :  { %1687 = vsyncpa [#allocation3], 1 }
 0x4fe   :  { %1689 = vsyncpa [#allocation3 + $0x1], 1 }
 0x4ff   :  { %1690 = vsyncpa [#allocation5], 1 }
 0x500   :  { %1692 = vsyncpa [#allocation5 + $0x1], 1 }

</bundles_post_ra>
